<compile_context>
chip_gen: v7x
topology: tpu7x:2x2x1
jax: 0.10.0
libtpu: 0.0.40
codegen_flags: <defaults>
</compile_context>

<pallas_src>
import functools
import math

import jax
import jax.numpy as jnp
from jax import lax
from jax.experimental import pallas as pl
from jax.experimental.pallas import tpu as pltpu


# ---------------------------------------------------------------------------
# Hardware-aware sizing helpers
# ---------------------------------------------------------------------------

def _round_up(x, m):
    return (x + m - 1) // m * m


def _vmem_limit_bytes():
    """Scoped VMEM limit with headroom, keyed off the actual chip
    (64 MiB/core on v7x, 128 MiB on v5e/v6e)."""
    phys = 64 * 1024 * 1024
    try:
        phys = int(pltpu.get_tpu_info().vmem_capacity_bytes)
    except Exception:
        pass
    return int(min(phys * 9 // 16, 100 * 1024 * 1024))


def _choose_row_tile(M, K, Cq, in_itemsize, out_itemsize, budget, max_tile=2048):
    """Row tile for the fused projection matmul: multiple of 8 (sublane),
    VMEM-budget capped, and sized to expose >=2 grid steps when possible."""
    per_row = 2 * (K * in_itemsize + Cq * out_itemsize) + 4 * Cq
    cap = max(8, min(max_tile, budget // max(per_row, 1)))
    cap = max(8, cap // 8 * 8)
    if M <= 8:
        return M
    t = min(cap, _round_up(pl.cdiv(M, 2), 8))
    return min(t, M)


def _choose_q_rows(Ho, Wo, win, q_rows=None, target_tokens=512, max_tokens=2048):
    """Rows of the feature map per query tile.  Must divide Ho, cover the
    window (so a +-1 row-block band suffices), and give a sublane-aligned
    token count."""
    if q_rows is not None:
        return q_rows
    cands = [r for r in range(1, Ho + 1)
             if Ho % r == 0 and r >= min(win, Ho)
             and ((r * Wo) % 8 == 0 or r == Ho)]
    if not cands:
        return Ho
    ok = [r for r in cands if r * Wo <= max_tokens] or [min(cands)]
    return min(ok, key=lambda r: abs(r * Wo - target_tokens))


def _choose_bh_tile(BH, TQ, D, NB, nblk, in_itemsize, out_itemsize, budget):
    """(batch*head) slices per attention grid step: fit double-buffered
    q/kv-band/out tiles plus the f32 score intermediates in the budget,
    keep >=2 grid steps for megacore when possible, and divide BH."""
    per = (2 * (1 + 2 * NB) * TQ * D * in_itemsize      # dbl-buffered q + kv band
           + 2 * TQ * D * out_itemsize                  # dbl-buffered out
           + (NB + 1) * TQ * TQ * 4)                    # f32 scores / probs
    t = max(1, min(BH, budget // max(per, 1)))
    while BH % t:
        t -= 1
    if nblk * (BH // t) < 2 and BH >= 2:
        t = max(1, BH // 2)
        while BH % t:
            t -= 1
    return t


# ---------------------------------------------------------------------------
# Fused tokenizer-conv + qkv-conv projection kernel
# ---------------------------------------------------------------------------

def _fused_proj_kernel(x_ref, wt_ref, bt_ref, wq_ref, bq_ref, o_ref):
    # 3x3/stride-2 tokenizer conv (matmul over pre-gathered im2col patches)
    # fused with the 1x1 qkv conv: the (TM, tok_ch) intermediate never leaves
    # vregs/VMEM.  bf16 MXU operands, f32 accumulation, f32 bias adds.
    # Dropout between the two convs is identity in eval mode.
    tok = jnp.dot(x_ref[...], wt_ref[...],
                  preferred_element_type=jnp.float32) + bt_ref[...]
    qkv = jnp.dot(tok.astype(wq_ref.dtype), wq_ref[...],
                  preferred_element_type=jnp.float32) + bq_ref[...]
    o_ref[...] = qkv.astype(o_ref.dtype)


def fused_projection(patches, w_tok, b_tok, w_qkv, b_qkv, *, out_dtype):
    """(M, K) @ (K, tok_ch) + b_tok, then @ (tok_ch, Cq) + b_qkv, one pass.
    Cq is expected to be pre-padded to a multiple of 128 (lane-dense stores)."""
    M, K = patches.shape
    tok_ch = w_tok.shape[1]
    Cq = w_qkv.shape[1]
    vmem_limit = _vmem_limit_bytes()
    TM = _choose_row_tile(M, K, Cq, patches.dtype.itemsize,
                          jnp.dtype(out_dtype).itemsize, vmem_limit // 2)
    grid = (pl.cdiv(M, TM),)
    cost = pl.CostEstimate(
        flops=2 * M * K * tok_ch + 2 * M * tok_ch * Cq,
        transcendentals=0,
        bytes_accessed=(M * K + K * tok_ch + tok_ch * Cq) * patches.dtype.itemsize
                       + M * Cq * jnp.dtype(out_dtype).itemsize + (tok_ch + Cq) * 4,
    )
    return pl.pallas_call(
        _fused_proj_kernel,
        out_shape=jax.ShapeDtypeStruct((M, Cq), out_dtype),
        grid=grid,
        in_specs=[
            pl.BlockSpec((TM, K), lambda i: (i, 0)),
            pl.BlockSpec((K, tok_ch), lambda i: (0, 0)),
            pl.BlockSpec((1, tok_ch), lambda i: (0, 0)),
            pl.BlockSpec((tok_ch, Cq), lambda i: (0, 0)),
            pl.BlockSpec((1, Cq), lambda i: (0, 0)),
        ],
        out_specs=pl.BlockSpec((TM, Cq), lambda i: (i, 0)),
        compiler_params=pltpu.CompilerParams(
            dimension_semantics=("parallel",),
            vmem_limit_bytes=vmem_limit,
        ),
        cost_estimate=cost,
    )(patches, w_tok, b_tok.reshape(1, tok_ch).astype(jnp.float32),
      w_qkv, b_qkv.reshape(1, Cq).astype(jnp.float32))


# ---------------------------------------------------------------------------
# Neighborhood attention kernel (KV-band tiled)
# ---------------------------------------------------------------------------

def _na_attn_kernel(q_ref, *refs, scale, win, Ho, Wo, TQ, NB, nblk):
    # q_ref          : (BH_T, TQ, D)       query row-block (bf16)
    # refs[:NB]      : NB key  chunks, each (BH_T, TQ, D)  (clamped band)
    # refs[NB:2*NB]  : NB value chunks, each (BH_T, TQ, D)
    # refs[2*NB]     : output (BH_T, TQ, D)
    k_refs = refs[:NB]
    v_refs = refs[NB:2 * NB]
    o_ref = refs[2 * NB]

    t = pl.program_id(1)
    bs = jnp.clip(t - 1, 0, nblk - NB)          # first kv row-block of the band

    # Fold the softmax scale into q: TQ*D multiplies instead of TQ*band.
    q = q_ref[...] * jnp.asarray(scale, q_ref.dtype)

    # Query-side window bounds, generated in-register from iota (no S x S bias
    # in HBM, no per-tile index tables).
    q_idx = t * TQ + lax.broadcasted_iota(jnp.int32, (TQ, 1), 0)
    q_row = q_idx // Wo
    q_col = q_idx - q_row * Wo
    lo_i = jnp.clip(q_row - win // 2, 0, Ho - win)
    lo_j = jnp.clip(q_col - win // 2, 0, Wo - win)
    hi_i = lo_i + win
    hi_j = lo_j + win

    neg = jnp.float32(-1e9)
    s_parts = []
    m = None
    for j in range(NB):
        s = jnp.einsum('bqd,bkd->bqk', q, k_refs[j][...],
                       preferred_element_type=jnp.float32)
        k_idx = (bs + j) * TQ + lax.broadcasted_iota(jnp.int32, (1, TQ), 1)
        k_row = k_idx // Wo
        k_col = k_idx - k_row * Wo
        kmask = ((k_row >= lo_i) & (k_row < hi_i)
                 & (k_col >= lo_j) & (k_col < hi_j))        # (TQ, TQ)
        s = jnp.where(kmask[None], s, neg)
        s_parts.append(s)
        mj = jnp.max(s, axis=-1, keepdims=True)
        m = mj if m is None else jnp.maximum(m, mj)

    l = jnp.zeros_like(m)
    acc = jnp.zeros(q.shape, jnp.float32)
    for j in range(NB):
        p = jnp.exp(s_parts[j] - m)             # masked entries underflow to 0
        l = l + jnp.sum(p, axis=-1, keepdims=True)
        acc = acc + jnp.einsum('bqk,bkd->bqd', p.astype(v_refs[j].dtype),
                               v_refs[j][...],
                               preferred_element_type=jnp.float32)

    o_ref[...] = (acc * pl.reciprocal(l, approx=False)).astype(o_ref.dtype)


def _kv_index_map(j, nblk, NB):
    def index_map(b, t):
        return (b, jnp.clip(t - 1, 0, nblk - NB) + j, 0)
    return index_map


def neighborhood_attention(q, k, v, *, Ho, Wo, win, scale, q_rows=None,
                           out_dtype=jnp.float32):
    """q, k, v: (BH, S, D) with S = Ho*Wo (row-major tokens). Returns (BH, S, D)."""
    BH, S, D = q.shape
    assert S == Ho * Wo
    assert win <= Ho and win <= Wo, "neighborhood window larger than feature map"

    R = _choose_q_rows(Ho, Wo, win, q_rows)          # query rows per tile
    assert Ho % R == 0, "q_rows must divide the feature-map height"
    TQ = R * Wo
    nblk = S // TQ
    assert TQ == S or TQ % 8 == 0, "query tile must be sublane aligned"
    assert nblk <= 3 or R >= win, "q_rows must cover the window for banding"
    NB = min(3, nblk)                                # kv row-blocks in the band

    vmem_limit = _vmem_limit_bytes()
    BH_T = _choose_bh_tile(BH, TQ, D, NB, nblk, q.dtype.itemsize,
                           jnp.dtype(out_dtype).itemsize, vmem_limit // 2)
    grid = (BH // BH_T, nblk)

    kernel = functools.partial(_na_attn_kernel, scale=scale, win=win, Ho=Ho,
                               Wo=Wo, TQ=TQ, NB=NB, nblk=nblk)
    qo_spec = pl.BlockSpec((BH_T, TQ, D), lambda b, t: (b, t, 0))
    kv_specs = [pl.BlockSpec((BH_T, TQ, D), _kv_index_map(j, nblk, NB))
                for j in range(NB)]

    itemsize = q.dtype.itemsize
    cost = pl.CostEstimate(
        flops=4 * BH * S * NB * TQ * D,
        transcendentals=BH * S * NB * TQ,
        bytes_accessed=BH * S * D * ((1 + 2 * NB) * itemsize
                                     + jnp.dtype(out_dtype).itemsize),
    )
    return pl.pallas_call(
        kernel,
        out_shape=jax.ShapeDtypeStruct((BH, S, D), out_dtype),
        grid=grid,
        in_specs=[qo_spec] + kv_specs + kv_specs,
        out_specs=qo_spec,
        compiler_params=pltpu.CompilerParams(
            dimension_semantics=("parallel", "parallel"),
            vmem_limit_bytes=vmem_limit,
        ),
        cost_estimate=cost,
    )(q, *([k] * NB), *([v] * NB))


# ---------------------------------------------------------------------------
# Glue (plain JAX): im2col, parameter setup, full forward
# ---------------------------------------------------------------------------

def im2col_nhwc(x_nhwc, kh, kw, stride, pad):
    """Extract conv patches. Returns (N, Ho, Wo, kh*kw*Cin) ordered (di, dj, cin)."""
    # TODO(synk): fuse the 3x3/stride-2 tap gather into the projection kernel
    # (9 shifted (TM, Cin) matmuls) to avoid materializing patches in HBM.
    N, H, W, C = x_nhwc.shape
    Ho = (H + 2 * pad - kh) // stride + 1
    Wo = (W + 2 * pad - kw) // stride + 1
    xp = jnp.pad(x_nhwc, ((0, 0), (pad, pad), (pad, pad), (0, 0)))
    cols = []
    for di in range(kh):
        for dj in range(kw):
            cols.append(xp[:, di:di + stride * Ho:stride, dj:dj + stride * Wo:stride, :])
    return jnp.concatenate(cols, axis=-1), Ho, Wo


def init_params(key, in_channels, tok_channels, num_heads, head_dim, conv_k):
    k1, k2, k3, k4 = jax.random.split(key, 4)
    fan_tok = in_channels * conv_k * conv_k
    bound_tok = 1.0 / math.sqrt(fan_tok)
    qkv_out = 3 * num_heads * head_dim
    bound_qkv = 1.0 / math.sqrt(tok_channels)
    return {
        # PyTorch Conv2d weight layout (Cout, Cin, kh, kw)
        "tok_w": jax.random.uniform(k1, (tok_channels, in_channels, conv_k, conv_k),
                                    jnp.float32, -bound_tok, bound_tok),
        "tok_b": jax.random.uniform(k2, (tok_channels,), jnp.float32, -bound_tok, bound_tok),
        "qkv_w": jax.random.uniform(k3, (qkv_out, tok_channels, 1, 1),
                                    jnp.float32, -bound_qkv, bound_qkv),
        "qkv_b": jax.random.uniform(k4, (qkv_out,), jnp.float32, -bound_qkv, bound_qkv),
    }


def shared_scale_na_forward(x_nchw, params, *, num_heads, head_dim,
                            conv_k=3, conv_stride=2, conv_pad=1,
                            na_kernel_size=3, q_rows=None,
                            compute_dtype=jnp.bfloat16):
    """Forward pass of SharedScaleNA. x_nchw: (N, C_in, H, W).
    Returns a list of num_heads arrays, each (N, head_dim, H', W') (NCHW)."""
    N, Cin, H, W = x_nchw.shape
    # bf16 activations for the MXU; all accumulation / softmax math stays f32.
    x_nhwc = jnp.transpose(x_nchw, (0, 2, 3, 1)).astype(compute_dtype)

    # ---- im2col patches for the stride-2 tokenizer conv (bf16 in HBM) ----
    patches, Ho, Wo = im2col_nhwc(x_nhwc, conv_k, conv_k, conv_stride, conv_pad)

    # ---- fused tokenizer conv + (dropout eval = identity) + 1x1 qkv conv ----
    tok_w_mat = jnp.transpose(params["tok_w"], (2, 3, 1, 0)).reshape(
        conv_k * conv_k * Cin, -1).astype(compute_dtype)
    tok_ch = tok_w_mat.shape[1]
    qkv_w_mat = jnp.transpose(params["qkv_w"], (2, 3, 1, 0)).reshape(
        tok_ch, -1).astype(compute_dtype)
    Cq = qkv_w_mat.shape[1]
    assert Cq == 3 * num_heads * head_dim
    # Zero-pad the output channel dim to a lane-dense multiple of 128.
    Cq_pad = _round_up(Cq, 128)
    qkv_b = params["qkv_b"]
    if Cq_pad != Cq:
        qkv_w_mat = jnp.pad(qkv_w_mat, ((0, 0), (0, Cq_pad - Cq)))
        qkv_b = jnp.pad(qkv_b, (0, Cq_pad - Cq))

    M = N * Ho * Wo
    qkv = fused_projection(patches.reshape(M, -1), tok_w_mat, params["tok_b"],
                           qkv_w_mat, qkv_b, out_dtype=compute_dtype)
    qkv = qkv[:, :Cq]                                              # (M, 3*heads*D)

    # ---- transform_to_nhw1c: split q/k/v and heads (all kept (BH, S, D)) ----
    S = Ho * Wo
    qkv = qkv.reshape(N, S, 3, num_heads, head_dim)
    qkv = jnp.transpose(qkv, (2, 0, 3, 1, 4))                      # (3, N, H, S, D)
    q = qkv[0].reshape(N * num_heads, S, head_dim)
    k = qkv[1].reshape(N * num_heads, S, head_dim)
    v = qkv[2].reshape(N * num_heads, S, head_dim)

    # ---- neighborhood attention (Pallas, KV-band tiled, in-kernel mask) ----
    scale = head_dim ** -0.5
    attn = neighborhood_attention(q, k, v, Ho=Ho, Wo=Wo, win=na_kernel_size,
                                  scale=scale, q_rows=q_rows,
                                  out_dtype=jnp.float32)           # (N*H, S, D)

    # ---- chunk per head + transform_from_nhw1c (-> NCHW) ----
    attn = attn.reshape(N, num_heads, Ho, Wo, head_dim)
    attn = jnp.transpose(attn, (0, 1, 4, 2, 3))                    # (N, H, D, Ho, Wo)
    return [attn[:, h] for h in range(num_heads)]


# ---------------------------------------------------------------------------
# Pure-JAX f32 reference (for correctness check in the demo)
# ---------------------------------------------------------------------------

def _reference_forward(x_nchw, params, *, num_heads, head_dim,
                       conv_k, conv_stride, conv_pad, na_kernel_size):
    N, Cin, H, W = x_nchw.shape
    x_nhwc = jnp.transpose(x_nchw, (0, 2, 3, 1))
    patches, Ho, Wo = im2col_nhwc(x_nhwc, conv_k, conv_k, conv_stride, conv_pad)
    tok_w = jnp.transpose(params["tok_w"], (2, 3, 1, 0)).reshape(conv_k * conv_k * Cin, -1)
    tok = patches.reshape(N * Ho * Wo, -1) @ tok_w + params["tok_b"]
    qkv_w = jnp.transpose(params["qkv_w"], (2, 3, 1, 0)).reshape(tok_w.shape[1], -1)
    qkv = tok @ qkv_w + params["qkv_b"]
    S = Ho * Wo
    qkv = qkv.reshape(N, S, 3, num_heads, head_dim)
    q = jnp.transpose(qkv[:, :, 0], (0, 2, 1, 3))
    k = jnp.transpose(qkv[:, :, 1], (0, 2, 1, 3))
    v = jnp.transpose(qkv[:, :, 2], (0, 2, 1, 3))

    def axis_mask(n, win):
        idx = jnp.arange(n)
        st = jnp.clip(idx - win // 2, 0, n - win)
        return (idx[None, :] >= st[:, None]) & (idx[None, :] < st[:, None] + win)

    mi = axis_mask(Ho, na_kernel_size)
    mj = axis_mask(Wo, na_kernel_size)
    mask = (mi[:, None, :, None] & mj[None, :, None, :]).reshape(S, S)
    s = jnp.einsum('nhqd,nhkd->nhqk', q, k) * (head_dim ** -0.5)
    s = jnp.where(mask[None, None], s, -jnp.inf)
    p = jax.nn.softmax(s, axis=-1)
    o = jnp.einsum('nhqk,nhkd->nhqd', p, v)                     # (N, heads, S, D)
    o = jnp.transpose(o, (0, 1, 3, 2)).reshape(N, num_heads, head_dim, Ho, Wo)
    return [o[:, h] for h in range(num_heads)]


# ---------------------------------------------------------------------------
# Demo
# ---------------------------------------------------------------------------

if __name__ == "__main__":
    key = jax.random.PRNGKey(0)
    kx, kp = jax.random.split(key)

    N, C_in = 2, 4
    tok_channels = 8          # conv_params.out_channels
    num_heads = 2
    head_dim = 8              # intermediate_channels
    win = 3                   # attn_params neighborhood window

    params = init_params(kp, C_in, tok_channels, num_heads, head_dim, conv_k=3)

    def check(H, W, q_rows):
        x = jax.random.normal(kx, (N, C_in, H, W), jnp.float32)
        outs = shared_scale_na_forward(
            x, params, num_heads=num_heads, head_dim=head_dim,
            conv_k=3, conv_stride=2, conv_pad=1, na_kernel_size=win,
            q_rows=q_rows)
        outs = [jax.block_until_ready(o) for o in outs]
        refs = _reference_forward(
            x, params, num_heads=num_heads, head_dim=head_dim,
            conv_k=3, conv_stride=2, conv_pad=1, na_kernel_size=win)
        assert len(outs) == num_heads
        for o, r in zip(outs, refs):
            assert o.shape == (N, head_dim, H // 2, W // 2)
            assert bool(jnp.all(jnp.isfinite(o)))
            # Tolerance: bf16 MXU operands with f32 accumulation.
            assert bool(jnp.allclose(o, r, rtol=5e-2, atol=2e-2)), \
                float(jnp.max(jnp.abs(o - r)))

    # Dense path (single kv block): the small reference shape.
    check(16, 16, q_rows=None)
    # Banded paths: 2-block and 3-block clamped kv bands.
    check(32, 32, q_rows=8)
    check(32, 32, q_rows=4)
    print("KERNEL_OK")
</pallas_src>

<mosaic_0001>
module attributes {stable_mosaic.version = 11 : i64} {
  func.func @_fused_proj_kernel(%arg0: i32, %arg1: memref<64x36xbf16, #tpu.memory_space<vmem>>, %arg2: memref<36x8xbf16, #tpu.memory_space<vmem>>, %arg3: memref<1x8xf32, #tpu.memory_space<vmem>>, %arg4: memref<8x128xbf16, #tpu.memory_space<vmem>>, %arg5: memref<1x128xf32, #tpu.memory_space<vmem>>, %arg6: memref<64x128xbf16, #tpu.memory_space<vmem>>) attributes {dimension_semantics = [#tpu.dimension_semantics<parallel>], iteration_bounds = array<i64: 2>, scalar_prefetch = 0 : i64, scratch_operands = 0 : i64, tpu.core_type = #tpu.core_type<tc>, window_params = [{transform_indices = @transform_0, window_bounds = array<i64: 64, 36>}, {pipeline_mode = #tpu.pipeline_mode<synchronous>, transform_indices = @transform_1, window_bounds = array<i64: 36, 8>}, {pipeline_mode = #tpu.pipeline_mode<synchronous>, transform_indices = @transform_2, window_bounds = array<i64: 1, 8>}, {pipeline_mode = #tpu.pipeline_mode<synchronous>, transform_indices = @transform_3, window_bounds = array<i64: 8, 128>}, {pipeline_mode = #tpu.pipeline_mode<synchronous>, transform_indices = @transform_4, window_bounds = array<i64: 1, 128>}, {transform_indices = @transform_5, window_bounds = array<i64: 64, 128>}]} {
    %c0 = arith.constant 0 : index
    %c0_0 = arith.constant 0 : index
    %0 = vector.load %arg1[%c0, %c0_0] : memref<64x36xbf16, #tpu.memory_space<vmem>>, vector<64x36xbf16>
    %c0_1 = arith.constant 0 : index
    %c0_2 = arith.constant 0 : index
    %1 = vector.load %arg2[%c0_1, %c0_2] : memref<36x8xbf16, #tpu.memory_space<vmem>>, vector<36x8xbf16>
    %cst = arith.constant dense<0.000000e+00> : vector<64x8xf32>
    %2 = tpu.matmul %0, %1, %cst {dimension_numbers = #tpu.dot_dimension_numbers<[1], [0], [0], [1], [0, 0, 1, 1], [], []>} : vector<64x36xbf16>, vector<36x8xbf16>, vector<64x8xf32> -> vector<64x8xf32>
    %c0_3 = arith.constant 0 : index
    %c0_4 = arith.constant 0 : index
    %3 = vector.load %arg3[%c0_3, %c0_4] : memref<1x8xf32, #tpu.memory_space<vmem>>, vector<1x8xf32>
    %4 = vector.broadcast %3 : vector<1x8xf32> to vector<64x8xf32>
    %5 = arith.addf %2, %4 : vector<64x8xf32>
    %6 = arith.truncf %5 : vector<64x8xf32> to vector<64x8xbf16>
    %c0_5 = arith.constant 0 : index
    %c0_6 = arith.constant 0 : index
    %7 = vector.load %arg4[%c0_5, %c0_6] : memref<8x128xbf16, #tpu.memory_space<vmem>>, vector<8x128xbf16>
    %cst_7 = arith.constant dense<0.000000e+00> : vector<64x128xf32>
    %8 = tpu.matmul %6, %7, %cst_7 {dimension_numbers = #tpu.dot_dimension_numbers<[1], [0], [0], [1], [0, 0, 1, 1], [], []>} : vector<64x8xbf16>, vector<8x128xbf16>, vector<64x128xf32> -> vector<64x128xf32>
    %c0_8 = arith.constant 0 : index
    %c0_9 = arith.constant 0 : index
    %9 = vector.load %arg5[%c0_8, %c0_9] : memref<1x128xf32, #tpu.memory_space<vmem>>, vector<1x128xf32>
    %10 = vector.broadcast %9 : vector<1x128xf32> to vector<64x128xf32>
    %11 = arith.addf %8, %10 : vector<64x128xf32>
    %12 = arith.truncf %11 : vector<64x128xf32> to vector<64x128xbf16>
    %c0_10 = arith.constant 0 : index
    %c0_11 = arith.constant 0 : index
    %13 = vector.load %arg6[%c0_10, %c0_11] : memref<64x128xbf16, #tpu.memory_space<vmem>>, vector<64x128xbf16>
    tpu.vector_store %arg6[%c0_10, %c0_11], %12 {strides = array<i32>} : memref<64x128xbf16, #tpu.memory_space<vmem>>, vector<64x128xbf16>,
    return
  }
  func.func @transform_0(%arg0: i32) -> (i32, i32) {
    %c0_i32 = arith.constant 0 : i32
    %c0_i32_0 = arith.constant 0 : i32
    return %arg0, %c0_i32 : i32, i32
  }
  func.func @transform_1(%arg0: i32) -> (i32, i32) {
    %c0_i32 = arith.constant 0 : i32
    %c0_i32_0 = arith.constant 0 : i32
    %c0_i32_1 = arith.constant 0 : i32
    return %c0_i32, %c0_i32_0 : i32, i32
  }
  func.func @transform_2(%arg0: i32) -> (i32, i32) {
    %c0_i32 = arith.constant 0 : i32
    %c0_i32_0 = arith.constant 0 : i32
    %c0_i32_1 = arith.constant 0 : i32
    return %c0_i32, %c0_i32_0 : i32, i32
  }
  func.func @transform_3(%arg0: i32) -> (i32, i32) {
    %c0_i32 = arith.constant 0 : i32
    %c0_i32_0 = arith.constant 0 : i32
    %c0_i32_1 = arith.constant 0 : i32
    return %c0_i32, %c0_i32_0 : i32, i32
  }
  func.func @transform_4(%arg0: i32) -> (i32, i32) {
    %c0_i32 = arith.constant 0 : i32
    %c0_i32_0 = arith.constant 0 : i32
    %c0_i32_1 = arith.constant 0 : i32
    return %c0_i32, %c0_i32_0 : i32, i32
  }
  func.func @transform_5(%arg0: i32) -> (i32, i32) {
    %c0_i32 = arith.constant 0 : i32
    %c0_i32_0 = arith.constant 0 : i32
    return %arg0, %c0_i32 : i32, i32
  }
}

</mosaic_0001>

<bundles_post_ra>
// kernel: tpu_custom_call.1
= control target key start
LH: loop header
LB: loop body
LE: loop exit
PB: predicated region body
PF: predicated region fallthrough
CT: control target
= control target key end

     0   :  { %10 = vsyncpa [#allocation3], 0  ;;  %s950_s0 = inlined_call_operand.vmem [shape: bf16[128,36], index: 0, kind: input, shape index: {}]   ;;  %s951_s1 = inlined_call_operand.vmem [shape: bf16[36,8], index: 1, kind: input, shape index: {}]   ;;  %s952_s2 = inlined_call_operand.vmem [shape: f32[1,8], index: 2, kind: input, shape index: {}]   ;;  %s953_s3 = inlined_call_operand.vmem [shape: bf16[8,128], index: 3, kind: input, shape index: {}]   ;;  %s954_s4 = inlined_call_operand.vmem [shape: f32[1,128], index: 4, kind: input, shape index: {}]   ;;  %s955_s5 = inlined_call_operand.hbm [shape: bf16[128,128], index: 5, kind: output, shape index: {}]  }
   0x1   :  { %12 = vsyncpa [#allocation3 + $0x1], 0  ;;  %s826_s18 = smov 0   ;;  %s828_s19 = smov 0  }
   0x2   :  { %s830_s20 = smov 0   ;;  %s832_s21 = smov 0  }
   0x3 LB: > { %s847_s22 = sadd.s32 4294967295, %s791_s21   ;;  %s574_s23 = sadd.s32 4294967294, %s791_s21   ;;  %s791_s21 = sphi %s832_s21, %s961_s21   ;;  %s787_s20 = sphi %s830_s20, %s960_s20   ;;  %s783_s19 = sphi %s828_s19, %s959_s19   ;;  %s779_s18 = sphi %s826_s18, %s958_s18  }
   0x4   : > { %s851_s24 = sadd.s32 1, %s791_s21   ;;  %s135_s25 = sadd.s32 1, %s787_s20 }
   0x5   : > { %s132_s26 = ssub.s32 %s791_s21, %s851_s24  ;;  %p145_p0 = scmp.ne.s32.totalorder %s787_s20, %s783_s19 }
   0x6   : > { %p133_p1 = scmp.eq.s32.totalorder %s132_s26, 0  ;;  %p146_p2 = scmp.eq.s32.totalorder %s847_s22, 1 }
   0x7   : > { %p151_p3 = scmp.ne.s32.totalorder %s783_s19, %s779_s18  ;;  %p152_p4 = scmp.eq.s32.totalorder %s574_s23, 1 }
   0x8   : > { %s862_s27 = scalar_select %p133_p1, %s787_s20, %s135_s25  }
   0x9   : > { %p864_p5 = por %p146_p2, %p145_p0  ;;  %p868_p6 = por %p152_p4, %p151_p3 }
   0xa   : > { %p577_p7 = scmp.ge.s32.totalorder %s791_s21, 1  ;;  %p191_p8 = scmp.lt.s32.totalorder %s791_s21, 3 }
   0xc   : > { %p192_p9 = pnand %p577_p7, %p191_p8 }
   0xd   : > { %v722_v0 = vld [vmem:[%s951_s1] sm:$0xff] (!%p192_p9)   ;;  %v723_v1 = vld [vmem:[%s951_s1 + $0x8] sm:$0xff] (!%p192_p9)   ;;  %s579_s9 = sshll.u32 (!%p192_p9), %s847_s22, 3  ;;  %v724_v2 = vld [vmem:[%s951_s1 + $0x10] ss:$0 sps:$4 sm:$0x33] (!%p192_p9)  }
   0xe   : > { %195 = sbr.rel (%p192_p9) target bundleno = 488 (0x1e8), region = 40  ;;  %655 = vmatprep.subr.bf16.mxu0 (!%p192_p9), %v722_v0  ;;  %p220_p10 = scmp.lt.s32.totalorder (!%p192_p9), %s579_s9, 15  ;;  %vm295_vm0 = vcmask (!%p192_p9), 1041408   ;;  %vm282_vm1 = vcmask (!%p192_p9), 293888   ;;  %v368_v8 = vld [vmem:[%s953_s3] sm:$0xf] (!%p192_p9) }
   0xf   : > { %656 = vmatpush3.bf16.msra.mxu0 (!%p192_p9), %v722_v0  ;;  %v297_v3 = vsel (!%p192_p9), %vm295_vm0, %v724_v2, 0  ;;  %vm389_vm2 = vcmask (!%p192_p9), 1043456   ;;  %v581_v11 = vld [vmem:[%s952_s2] ss:$0 sm:$0xff] (!%p192_p9)  ;;  %vm376_vm3 = vcmask (!%p192_p9), 64512   ;;  %s216_s26 = sand.u32 (!%p192_p9), 1, %s783_s19  }
  0x10   : > { %657 = vmatprep.subr.bf16.mxu0 (!%p192_p9), %v723_v1  ;;  %680 = vmatprep.subr.msk.bf16.mxu1 (!%p192_p9), %vm389_vm2, %v368_v8  ;;  %v391_v9 = vsel (!%p192_p9), %vm389_vm2, %v368_v8, 0  ;;  %v593_v32 = vld [vmem:[%s954_s4] ss:$0 sm:$0xff] (!%p192_p9)  ;;  %s578_s7 = sshll.u32 (!%p192_p9), %s216_s26, 5  ;;  %s619_s10 = sshll.u32 (!%p192_p9), %s847_s22, 9 }
  0x11   : > { %670 = vmatpush3.bf16.msra.mxu1 (!%p192_p9), %v391_v9  ;;  %s218_s8 = scalar_lea.vmem (!%p192_p9), [#allocation2], %s578_s7  ;;  %s905_s13 = scalar_lea.hbm (!%p192_p9), %s955_s5, %s619_s10 }
  0x12   : > { %s909_s22 = scalar_lea.sflag (!%p192_p9), [#allocation3], %s216_s26 }
  0x13   : > { %658 = vmatpush3.bf16.msra.mxu0 (!%p192_p9), %v723_v1 }
  0x14   : > { %679 = vmatprep.subr.msk.bf16.mxu0 (!%p192_p9), %vm295_vm0, %v724_v2 }
  0x15   : > { %s963_s9 = smov (!%p220_p10, %s579_s9), 15 }
  0x16   : > { %s580_s12 = sshll.u32 %s963_s9, 2  ;;  %s512_s9 = sshll.u32 %s218_s8, 4  ;;  %s900_s9 = int_to_ptr.vmem [resolvable:$true] %s512_s9 }
  0x17   : > { %s223_s15 = scalar_lea.vmem %s950_s0, %s580_s12  ;;  %660 = vmatpush3.bf16.msra.mxu0 %v297_v3  ;;  %s729_s14 = scalar_lea.vmem %s900_s9, 512 }
  0x18   : > { %v725_v4 = vld [vmem:[%s223_s15] sm:$0xff]   ;;  %v726_v5 = vld [vmem:[%s223_s15 + $0x8] sm:$0xff]   ;;  %v727_v6 = vld [vmem:[%s223_s15 + $0x10] sm:$0xff]   ;;  %p730_p11 = scmp.ne.s32.totalorder %s900_s9, %s729_s14 }
  0x19   : > { %661 = vmatprep.mubr.msk.bf16.mxu0 %vm282_vm1, %v725_v4  ;;  %v728_v7 = vld [vmem:[%s223_s15 + $0x18] sm:$0xff]   ;;  %s793_s15 = smov [#allocation2]  }
  0x1a   : > { %662 = vmatmul.mubr.msk.bf16.vlgmr.msra.gmra.mrb[0].mxu0 %vm282_vm1, %v726_v5  ;;  %p731_p12 = pnand %p730_p11, %p864_p5  ;;  %s733_s16 = sshll.u32 %s793_s15, 4  ;;  %s734_s16 = int_to_ptr.vmem [resolvable:$false] %s733_s16 }
  0x1b   : > { %665 = vmatprep.mubr.msk.bf16.mxu0 %vm282_vm1, %v727_v6  ;;  %s735_s17 = scalar_lea.vmem %s734_s16, 1024  ;;  %p736_p0 = scmp.lt.s32.totalorder %s900_s9, %s734_s16 }
  0x1c   : > { %p732_p13 = pneg %p731_p12  ;;  %p737_p1 = scmp.lt.s32.totalorder %s735_s17, %s729_s14 }
  0x1e   : > { %p738_p2 = por %p737_p1, %p736_p0 }
  0x20   : > { %p739_p3 = pnand %p738_p2, %p732_p13 }
  0x22   : > { %666 = vmatmul.mubr.msk.bf16.gmra.mrb[4].mxu0 %vm282_vm1, %v728_v7 }
  0xed   : > { %v663_v10 = vpop.f32.mrb[0].mxu0 }
  0xee   : > { %v333_v12 = vpop.f32.mrb[1].mxu0  ;;  %v342_v14 = vadd.f32 %v663_v10, %v581_v11 }
  0xef   : > { %v664_v13 = vpop.f32.mrb[2].mxu0  ;;  %v334_v17 = vadd.f32 %v581_v11, %v333_v12 }
  0xf0   : > { %v345_v15 = vadd.f32 %v664_v13, %v581_v11  ;;  %v336_v16 = vpop.f32.mrb[3].mxu0 }
  0xf1   : > { %v337_v18 = vadd.f32 %v581_v11, %v336_v16 }
  0xf2   : > { %v365_v19 = vpack.c.bf16 %v345_v15, %v342_v14 }
  0xf3   : > { %v364_v20 = vpack.c.bf16 %v337_v18, %v334_v17 }
  0xf5   : > { %v667_v21 = vpop.f32.mrb[4].mxu0  ;;  %671 = vmatprep.mubr.msk.bf16.mxu1 %vm376_vm3, %v364_v20 }
  0xf6   : > { %v349_v22 = vpop.f32.mrb[5].mxu0  ;;  %672 = vmatmul.mubr.msk.bf16.vlgmr.msra.gmra.mrb[0].mxu1 %vm376_vm3, %v365_v19  ;;  %v358_v24 = vadd.f32 %v667_v21, %v581_v11 }
  0xf7   : > { %v668_v23 = vpop.f32.mrb[6].mxu0  ;;  %v350_v27 = vadd.f32 %v581_v11, %v349_v22 }
  0xf8   : > { %v361_v25 = vadd.f32 %v668_v23, %v581_v11  ;;  %v352_v26 = vpop.f32.mrb[7].mxu0 }
  0xf9   : > { %v353_v28 = vadd.f32 %v581_v11, %v352_v26 }
  0xfa   : > { %v367_v29 = vpack.c.bf16 %v361_v25, %v358_v24 }
  0xfb   : > { %v366_v30 = vpack.c.bf16 %v353_v28, %v350_v27 }
  0xfd   : > { %675 = vmatprep.mubr.msk.bf16.mxu1 %vm376_vm3, %v366_v30 }
  0xfe   : > { %676 = vmatmul.mubr.msk.bf16.gmra.mrb[4].mxu1 %vm376_vm3, %v367_v29 }
 0x1c9   : > { %v673_v31 = vpop.f32.mrb[0].mxu1 }
 0x1ca   : > { %v427_v33 = vpop.f32.mrb[1].mxu1  ;;  %v436_v35 = vadd.f32 %v673_v31, %v593_v32 }
 0x1cb   : > { %v674_v34 = vpop.f32.mrb[2].mxu1  ;;  %v428_v38 = vadd.f32 %v593_v32, %v427_v33 }
 0x1cc   : > { %v439_v36 = vadd.f32 %v674_v34, %v593_v32  ;;  %v430_v37 = vpop.f32.mrb[3].mxu1 }
 0x1cd   : > { %v431_v39 = vadd.f32 %v593_v32, %v430_v37 }
 0x1ce   : > { %v628_v40 = vpack.c.bf16 %v439_v36, %v436_v35 }
 0x1cf   : > { %v623_v41 = vpack.c.bf16 %v431_v39, %v428_v38 }
 0x1d0   : > { %640 = vst [vmem:[%s218_s8 + $0x8] sm:$0xff] %v628_v40  }
 0x1d1   : > { %624 = vst [vmem:[%s218_s8] sm:$0xff] %v623_v41   ;;  %v677_v42 = vpop.f32.mrb[4].mxu1 }
 0x1d2   : > { %v443_v43 = vpop.f32.mrb[5].mxu1  ;;  %v452_v45 = vadd.f32 %v677_v42, %v593_v32 }
 0x1d3   : > { %v678_v44 = vpop.f32.mrb[6].mxu1  ;;  %v444_v48 = vadd.f32 %v593_v32, %v443_v43 }
 0x1d4   : > { %v455_v46 = vadd.f32 %v678_v44, %v593_v32  ;;  %v446_v47 = vpop.f32.mrb[7].mxu1 }
 0x1d5   : > { %v447_v49 = vadd.f32 %v593_v32, %v446_v47 }
 0x1d6   : > { %v638_v50 = vpack.c.bf16 %v455_v46, %v452_v45 }
 0x1d7   : > { %v633_v51 = vpack.c.bf16 %v447_v49, %v444_v48 }
 0x1d8   : > { %642 = vst [vmem:[%s218_s8 + $0x18] sm:$0xff] %v638_v50  }
 0x1d9   : > { %641 = vst [vmem:[%s218_s8 + $0x10] sm:$0xff] %v633_v51  }
 0x1da   : > { %742 = shalt.err (!%p739_p3)
}
 0x1db   : > { %s743_s23 = scalar_lea.hbm %s905_s13, 512  ;;  %s747_s30 = scalar_lea.hbm %s955_s5, 1024 }
 0x1dc   : > { %p744_p4 = scmp.ne.s32.totalorder %s905_s13, %s743_s23  ;;  %p748_p9 = scmp.lt.u32.totalorder %s905_s13, %s955_s5 }
 0x1dd   : > { %p749_p10 = scmp.lt.u32.totalorder %s747_s30, %s743_s23  ;;  %p751_p12 = scmp.lt.u32.totalorder %s743_s23, %s905_s13 }
 0x1de   : > { %p745_p7 = pnand %p744_p4, %p864_p5 }
 0x1df   : > { %p750_p11 = por %p749_p10, %p748_p9 }
 0x1e0   : > { %p746_p8 = pneg %p745_p7 }
 0x1e1   : > { %p752_p13 = por %p751_p12, %p750_p11 }
 0x1e3   : > { %p753_p0 = pnand %p752_p13, %p746_p8 }
 0x1e5   : > { %756 = shalt.err (!%p753_p0)
}
 0x1e6   : > { %s794_s8 = smov 64   ;;  %s795_s10 = smov 4  }
 0x1e7   : > { %681 = dma.vmem_to_hbm [thread:$0]  (%p864_p5), %s900_s9, 512, %s905_s13, %s909_s22, %s794_s8, %s794_s8, %s795_s10  }
 0x1e8 PF: > { %p687_p1 = scmp.ge.s32.totalorder %s791_s21, 2  ;;  %s527_s11 = sand.u32 1, %s779_s18  }
 0x1e9   : > { %s528_s12 = scalar_lea.sflag [#allocation3], %s527_s11 }
 0x1ea   : > { %p684_p2 = pnand %p687_p1, %p868_p6 }
 0x1ec   : > { %774 = dma.done.wait (!%p684_p2), %s528_s12, 512  }
 0x1ed   : > { %776 = vsyncadd (!%p684_p2), %s528_s12, 4294966784  ;;  %p15_p3 = scmp.ge.s32.totalorder %s851_s24, 4   ;;  %s958_s18 = smov %s783_s19 }
 0x1ee   : > { %s959_s19 = smov %s787_s20  ;;  %s960_s20 = smov %s862_s27 }
 0x1ef   : > { %s961_s21 = smov %s851_s24  ;;  %17 = sbr.rel (!%p15_p3) target bundleno = 3 (0x3), region = 75 }
 0x1f6   :  { %533 = vsyncpa [#allocation3], 1 }
 0x1f7   :  { %535 = vsyncpa [#allocation3 + $0x1], 1 }

</bundles_post_ra>
